<compile_context>
chip_gen: v5e
topology: v5e:2x2
jax: 0.10.0
libtpu: 0.0.40
codegen_flags: <defaults>
</compile_context>

<pallas_src>
import functools

import jax
import jax.numpy as jnp
from jax import lax
from jax.experimental import pallas as pl
from jax.experimental.pallas import tpu as pltpu

_LANES = 128


def _round_up(v, m):
    return (v + m - 1) // m * m


# ---------------------------------------------------------------------------
# Pallas kernels
# ---------------------------------------------------------------------------

def _masked_log_softmax(z, num_classes):
    # z: [tm, C_pad] f32.  Padded lanes (zero-weight columns) are masked to a
    # large negative value so they do not perturb max / sum; the full 128-lane
    # slab is stored densely (unmasked vst) and sliced in the wrapper.
    lane = lax.broadcasted_iota(jnp.int32, z.shape, dimension=1)
    zm = jnp.where(lane < num_classes, z, -1e30)
    m = jnp.max(zm, axis=1, keepdims=True)
    s = zm - m
    lse = jnp.log(jnp.sum(jnp.exp(s), axis=1, keepdims=True))
    return s - lse


def _mlp_kernel(x_ref, w1_ref, b1_ref, w2_ref, b2_ref, o_ref, *,
                num_classes, apply_log_softmax):
    # Fused lin1 -> relu -> lin2 on one row tile.  With alpha == 1.0 the APPNP
    # propagation is a mathematical no-op, so applying log_softmax here gives
    # the whole forward in one kernel (A is never built nor DMA'd).
    h = jnp.dot(x_ref[...], w1_ref[...], preferred_element_type=jnp.float32)
    h = jnp.maximum(h + b1_ref[...], 0.0)
    z = jnp.dot(h, w2_ref[...], preferred_element_type=jnp.float32) + b2_ref[...]
    if apply_log_softmax:
        z = _masked_log_softmax(z, num_classes)
    o_ref[...] = z.astype(o_ref.dtype)


def _prop_kernel(a_hbm_ref, z_ref, o_ref, a_vmem, copy_sem, *,
                 K, alpha, num_classes):
    # General alpha < 1 path: dense APPNP propagation.
    # A arrives as bf16 in HBM (memory_space=pl.ANY) and is DMA'd exactly once
    # into a single VMEM buffer (no double-buffering: grid=(1,) never revisits
    # it), halving A's VMEM footprint vs the default BlockSpec pipeline.
    cp = pltpu.make_async_copy(a_hbm_ref, a_vmem, copy_sem)
    cp.start()
    cp.wait()

    z = z_ref[...]                      # f32 [N, C_pad]
    alpha_h = alpha * z                 # hoisted out of the K loop
    one_minus_alpha = 1.0 - alpha

    def body(_, cur):
        prop = jnp.dot(a_vmem[...], cur.astype(jnp.bfloat16),
                       preferred_element_type=jnp.float32)
        return one_minus_alpha * prop + alpha_h

    xk = lax.fori_loop(0, K, body, z)
    o_ref[...] = _masked_log_softmax(xk, num_classes).astype(o_ref.dtype)


# ---------------------------------------------------------------------------
# Wrappers
# ---------------------------------------------------------------------------

def normalized_adjacency(edge_index, num_nodes):
    """D^{-1/2} (A + I) D^{-1/2} as a dense [N, N] f32 matrix (GCN norm).

    Only needed when alpha < 1; precompute once per graph."""
    src = edge_index[0]
    dst = edge_index[1]
    A = jnp.zeros((num_nodes, num_nodes), jnp.float32).at[dst, src].set(1.0)
    A = jnp.maximum(A, jnp.eye(num_nodes, dtype=jnp.float32))  # add self loops
    deg = jnp.sum(A, axis=1)
    d_inv_sqrt = jnp.where(deg > 0, 1.0 / jnp.sqrt(deg), 0.0)
    return d_inv_sqrt[:, None] * A * d_inv_sqrt[None, :]


def init_params(key, num_features, hidden, num_classes):
    """Deterministic PyTorch-Linear-style init (uniform(-1/sqrt(fan_in), ...))."""
    k1, k2, k3, k4 = jax.random.split(key, 4)
    bnd1 = 1.0 / jnp.sqrt(num_features)
    bnd2 = 1.0 / jnp.sqrt(hidden)
    # Weights stored pre-transposed as [in, out] for in-kernel x @ W.
    w1 = jax.random.uniform(k1, (num_features, hidden), jnp.float32, -bnd1, bnd1)
    b1 = jax.random.uniform(k2, (1, hidden), jnp.float32, -bnd1, bnd1)
    w2 = jax.random.uniform(k3, (hidden, num_classes), jnp.float32, -bnd2, bnd2)
    b2 = jax.random.uniform(k4, (1, num_classes), jnp.float32, -bnd2, bnd2)
    return w1, b1, w2, b2


def _run_mlp(x, w1, b1, w2p, b2p, *, num_classes, apply_log_softmax,
             row_tile=None, out_dtype=jnp.float32):
    """Row-tiled fused lin1->relu->lin2 (+optional masked log_softmax).

    The node-row axis is zero-padded to a multiple of the tile so arbitrary N
    is supported with a large tile (amortizes the ~0.35us/step grid overhead);
    padded rows are sliced off by the caller."""
    N, F = x.shape
    H = w1.shape[1]
    C_pad = w2p.shape[1]

    tm = row_tile or min(1024, _round_up(N, 16))
    tm = max(16, _round_up(tm, 16))
    N_pad = _round_up(N, tm)
    if N_pad != N:
        x = jnp.zeros((N_pad, F), x.dtype).at[:N].set(x)

    kernel = functools.partial(_mlp_kernel, num_classes=num_classes,
                               apply_log_softmax=apply_log_softmax)
    return pl.pallas_call(
        kernel,
        out_shape=jax.ShapeDtypeStruct((N_pad, C_pad), out_dtype),
        grid=(N_pad // tm,),
        in_specs=[
            pl.BlockSpec((tm, F), lambda i: (i, 0)),
            pl.BlockSpec((F, H), lambda i: (0, 0)),
            pl.BlockSpec((1, H), lambda i: (0, 0)),
            pl.BlockSpec((H, C_pad), lambda i: (0, 0)),
            pl.BlockSpec((1, C_pad), lambda i: (0, 0)),
        ],
        out_specs=pl.BlockSpec((tm, C_pad), lambda i: (i, 0)),
        compiler_params=pltpu.CompilerParams(
            dimension_semantics=("parallel",)),
    )(x, w1, b1, w2p, b2p)


def appnp_net_forward(x, edge_index, params, *, K=10, alpha=1.0, a_hat=None,
                      row_tile=None, store_bf16=False):
    """Forward of APPNP_Net. Returns (log_softmax logits [N, C] f32, None)."""
    w1, b1, w2, b2 = params
    N, F = x.shape
    H = w1.shape[1]
    C = w2.shape[1]
    C_pad = _round_up(C, _LANES)

    # Zero-pad the classifier to a dense 128-wide lane slab (padded columns are
    # masked inside the kernel, sliced away below).
    w2p = jnp.zeros((H, C_pad), jnp.float32).at[:, :C].set(w2)
    b2p = jnp.zeros((1, C_pad), jnp.float32).at[:, :C].set(b2)

    out_dtype = jnp.bfloat16 if store_bf16 else jnp.float32

    if alpha == 1.0:
        # Fast path (the spec: APPNP(10, 1)): propagation is the identity, so
        # the adjacency is never built nor DMA'd.
        out = _run_mlp(x, w1, b1, w2p, b2p, num_classes=C,
                       apply_log_softmax=True, row_tile=row_tile,
                       out_dtype=out_dtype)
        return out[:N, :C].astype(jnp.float32), None

    # ----- general alpha < 1 path: z via the tiled MLP kernel, then dense -----
    # ----- propagation with a bf16, single-buffered, VMEM-resident A. ---------
    N_prop = _round_up(N, 16)
    z = _run_mlp(x, w1, b1, w2p, b2p, num_classes=C,
                 apply_log_softmax=False, row_tile=row_tile,
                 out_dtype=jnp.float32)[:N_prop]

    if a_hat is None:
        a_hat = normalized_adjacency(edge_index, N)
    a_pad = jnp.zeros((N_prop, N_prop), jnp.float32).at[:N, :N].set(a_hat)
    a_bf16 = a_pad.astype(jnp.bfloat16)   # halve A's HBM DMA; MXU ran bf16 anyway

    # Raise the scoped VMEM limit (v5e default is 16 MiB); A is the dominant
    # consumer and is single-buffered bf16.
    a_bytes = 2 * N_prop * N_prop                         # bf16 A, single buffer
    zio_bytes = 2 * 2 * N_prop * C_pad * 4                # z in + out, double-buffered
    tmp_bytes = 6 * N_prop * C_pad * 4                    # loop iterate headroom
    needed = a_bytes + zio_bytes + tmp_bytes + (4 << 20)
    vmem_limit = int(min(max(needed, 32 << 20), 128 << 20))

    kernel = functools.partial(_prop_kernel, K=K, alpha=float(alpha),
                               num_classes=C)
    out = pl.pallas_call(
        kernel,
        out_shape=jax.ShapeDtypeStruct((N_prop, C_pad), out_dtype),
        grid=(1,),
        in_specs=[
            pl.BlockSpec(memory_space=pl.ANY),            # A stays in HBM; one DMA
            pl.BlockSpec((N_prop, C_pad), lambda i: (0, 0)),
        ],
        out_specs=pl.BlockSpec((N_prop, C_pad), lambda i: (0, 0)),
        scratch_shapes=[
            pltpu.VMEM((N_prop, N_prop), jnp.bfloat16),   # single-buffered A
            pltpu.SemaphoreType.DMA(()),
        ],
        compiler_params=pltpu.CompilerParams(vmem_limit_bytes=vmem_limit),
    )(a_bf16, z)
    return out[:N, :C].astype(jnp.float32), None


def _forward_ref(x, params, a_hat, K, alpha):
    """Pure-JAX f32 reference for correctness checks."""
    w1, b1, w2, b2 = params
    h = jnp.maximum(x @ w1 + b1, 0.0)
    z = h @ w2 + b2
    xk = z
    if alpha != 1.0:
        for _ in range(K):
            xk = (1.0 - alpha) * (a_hat @ xk) + alpha * z
    return jax.nn.log_softmax(xk, axis=1)


# ---------------------------------------------------------------------------
# Main
# ---------------------------------------------------------------------------

if __name__ == "__main__":
    key = jax.random.PRNGKey(0)
    k_x, k_e, k_p, k_x2 = jax.random.split(key, 4)

    NUM_NODES = 64
    NUM_FEATURES = 32
    HIDDEN = 32
    NUM_CLASSES = 8
    NUM_EDGES = 256

    x = jax.random.normal(k_x, (NUM_NODES, NUM_FEATURES), jnp.float32)
    edge_index = jax.random.randint(k_e, (2, NUM_EDGES), 0, NUM_NODES, jnp.int32)
    params = init_params(k_p, NUM_FEATURES, HIDDEN, NUM_CLASSES)

    # --- primary path: the spec's APPNP(K=10, alpha=1) -> propagation no-op ---
    log_probs, _ = appnp_net_forward(x, edge_index, params, K=10, alpha=1.0)
    log_probs = jax.block_until_ready(log_probs)

    assert log_probs.shape == (NUM_NODES, NUM_CLASSES)
    assert bool(jnp.all(jnp.isfinite(log_probs)))
    assert bool(jnp.allclose(jnp.sum(jnp.exp(log_probs), axis=1), 1.0, atol=1e-4))
    ref = _forward_ref(x, params, None, 10, 1.0)
    assert bool(jnp.allclose(log_probs, ref, atol=1e-4, rtol=1e-4))

    # --- awkward node count (N not a multiple of 8): padded-row path ---------
    N2 = 50
    x2 = jax.random.normal(k_x2, (N2, NUM_FEATURES), jnp.float32)
    log_probs_odd, _ = appnp_net_forward(x2, edge_index, params, K=10, alpha=1.0)
    log_probs_odd = jax.block_until_ready(log_probs_odd)
    assert log_probs_odd.shape == (N2, NUM_CLASSES)
    ref_odd = _forward_ref(x2, params, None, 10, 1.0)
    assert bool(jnp.allclose(log_probs_odd, ref_odd, atol=1e-4, rtol=1e-4))

    # --- general path (alpha < 1): bf16 A, single-buffered, VMEM-resident ----
    a_hat = normalized_adjacency(edge_index, NUM_NODES)   # once per graph
    log_probs2, _ = appnp_net_forward(x, edge_index, params, K=10, alpha=0.1,
                                      a_hat=a_hat)
    log_probs2 = jax.block_until_ready(log_probs2)
    assert log_probs2.shape == (NUM_NODES, NUM_CLASSES)
    assert bool(jnp.all(jnp.isfinite(log_probs2)))
    assert bool(jnp.allclose(jnp.sum(jnp.exp(log_probs2), axis=1), 1.0, atol=1e-4))
    ref2 = _forward_ref(x, params, a_hat, 10, 0.1)
    # bf16 A / bf16 iterate over K=10 steps -> loose but meaningful tolerance.
    assert bool(jnp.allclose(log_probs2, ref2, atol=5e-2, rtol=5e-2))

    print("KERNEL_OK")
</pallas_src>

<mosaic_0001>
module attributes {stable_mosaic.version = 11 : i64} {
  func.func @_mlp_kernel(%arg0: i32, %arg1: memref<64x32xf32, #tpu.memory_space<vmem>>, %arg2: memref<32x32xf32, #tpu.memory_space<vmem>>, %arg3: memref<1x32xf32, #tpu.memory_space<vmem>>, %arg4: memref<32x128xf32, #tpu.memory_space<vmem>>, %arg5: memref<1x128xf32, #tpu.memory_space<vmem>>, %arg6: memref<64x128xf32, #tpu.memory_space<vmem>>) attributes {dimension_semantics = [#tpu.dimension_semantics<parallel>], iteration_bounds = array<i64: 1>, scalar_prefetch = 0 : i64, scratch_operands = 0 : i64, tpu.core_type = #tpu.core_type<tc>, window_params = [{transform_indices = @transform_0, window_bounds = array<i64: 64, 32>}, {pipeline_mode = #tpu.pipeline_mode<synchronous>, transform_indices = @transform_1, window_bounds = array<i64: 32, 32>}, {pipeline_mode = #tpu.pipeline_mode<synchronous>, transform_indices = @transform_2, window_bounds = array<i64: 1, 32>}, {pipeline_mode = #tpu.pipeline_mode<synchronous>, transform_indices = @transform_3, window_bounds = array<i64: 32, 128>}, {pipeline_mode = #tpu.pipeline_mode<synchronous>, transform_indices = @transform_4, window_bounds = array<i64: 1, 128>}, {transform_indices = @transform_5, window_bounds = array<i64: 64, 128>}]} {
    %c0 = arith.constant 0 : index
    %c0_0 = arith.constant 0 : index
    %0 = vector.load %arg1[%c0, %c0_0] : memref<64x32xf32, #tpu.memory_space<vmem>>, vector<64x32xf32>
    %c0_1 = arith.constant 0 : index
    %c0_2 = arith.constant 0 : index
    %1 = vector.load %arg2[%c0_1, %c0_2] : memref<32x32xf32, #tpu.memory_space<vmem>>, vector<32x32xf32>
    %cst = arith.constant dense<0.000000e+00> : vector<64x32xf32>
    %2 = tpu.matmul %0, %1, %cst {dimension_numbers = #tpu.dot_dimension_numbers<[1], [0], [0], [1], [0, 0, 1, 1], [], []>} : vector<64x32xf32>, vector<32x32xf32>, vector<64x32xf32> -> vector<64x32xf32>
    %c0_3 = arith.constant 0 : index
    %c0_4 = arith.constant 0 : index
    %3 = vector.load %arg3[%c0_3, %c0_4] : memref<1x32xf32, #tpu.memory_space<vmem>>, vector<1x32xf32>
    %4 = vector.broadcast %3 : vector<1x32xf32> to vector<64x32xf32>
    %5 = arith.addf %2, %4 : vector<64x32xf32>
    %cst_5 = arith.constant 0.000000e+00 : f32
    %6 = vector.broadcast %cst_5 : f32 to vector<64x32xf32>
    %7 = arith.maximumf %5, %6 : vector<64x32xf32>
    %c0_6 = arith.constant 0 : index
    %c0_7 = arith.constant 0 : index
    %8 = vector.load %arg4[%c0_6, %c0_7] : memref<32x128xf32, #tpu.memory_space<vmem>>, vector<32x128xf32>
    %cst_8 = arith.constant dense<0.000000e+00> : vector<64x128xf32>
    %9 = tpu.matmul %7, %8, %cst_8 {dimension_numbers = #tpu.dot_dimension_numbers<[1], [0], [0], [1], [0, 0, 1, 1], [], []>} : vector<64x32xf32>, vector<32x128xf32>, vector<64x128xf32> -> vector<64x128xf32>
    %c0_9 = arith.constant 0 : index
    %c0_10 = arith.constant 0 : index
    %10 = vector.load %arg5[%c0_9, %c0_10] : memref<1x128xf32, #tpu.memory_space<vmem>>, vector<1x128xf32>
    %11 = vector.broadcast %10 : vector<1x128xf32> to vector<64x128xf32>
    %12 = arith.addf %9, %11 : vector<64x128xf32>
    %13 = tpu.iota {dimensions = array<i32: 1>} : vector<64x128xi32>
    %c8_i32 = arith.constant 8 : i32
    %14 = vector.broadcast %c8_i32 : i32 to vector<64x128xi32>
    %15 = arith.cmpi slt, %13, %14 : vector<64x128xi32>
    %cst_11 = arith.constant -1.000000e+30 : f32
    %16 = vector.broadcast %cst_11 : f32 to vector<64x128xf32>
    %17 = arith.select %15, %12, %16 : vector<64x128xi1>, vector<64x128xf32>
    %cst_12 = arith.constant dense<0xFF800000> : vector<64xf32>
    %18 = vector.multi_reduction <maximumf>, %17, %cst_12 [1] : vector<64x128xf32> to vector<64xf32>
    %19 = vector.shape_cast %18 : vector<64xf32> to vector<64x1xf32>
    %20 = vector.broadcast %19 : vector<64x1xf32> to vector<64x128xf32>
    %21 = arith.subf %17, %20 : vector<64x128xf32>
    %22 = math.exp %21 : vector<64x128xf32>
    %cst_13 = arith.constant dense<0.000000e+00> : vector<64xf32>
    %23 = vector.multi_reduction <add>, %22, %cst_13 [1] : vector<64x128xf32> to vector<64xf32>
    %24 = vector.shape_cast %23 : vector<64xf32> to vector<64x1xf32>
    %25 = math.log %24 : vector<64x1xf32>
    %26 = vector.broadcast %25 : vector<64x1xf32> to vector<64x128xf32>
    %27 = arith.subf %21, %26 : vector<64x128xf32>
    %c0_14 = arith.constant 0 : index
    %c0_15 = arith.constant 0 : index
    %28 = vector.load %arg6[%c0_14, %c0_15] : memref<64x128xf32, #tpu.memory_space<vmem>>, vector<64x128xf32>
    tpu.vector_store %arg6[%c0_14, %c0_15], %27 {strides = array<i32>} : memref<64x128xf32, #tpu.memory_space<vmem>>, vector<64x128xf32>,
    return
  }
  func.func @transform_0(%arg0: i32) -> (i32, i32) {
    %c0_i32 = arith.constant 0 : i32
    %c0_i32_0 = arith.constant 0 : i32
    return %arg0, %c0_i32 : i32, i32
  }
  func.func @transform_1(%arg0: i32) -> (i32, i32) {
    %c0_i32 = arith.constant 0 : i32
    %c0_i32_0 = arith.constant 0 : i32
    %c0_i32_1 = arith.constant 0 : i32
    return %c0_i32, %c0_i32_0 : i32, i32
  }
  func.func @transform_2(%arg0: i32) -> (i32, i32) {
    %c0_i32 = arith.constant 0 : i32
    %c0_i32_0 = arith.constant 0 : i32
    %c0_i32_1 = arith.constant 0 : i32
    return %c0_i32, %c0_i32_0 : i32, i32
  }
  func.func @transform_3(%arg0: i32) -> (i32, i32) {
    %c0_i32 = arith.constant 0 : i32
    %c0_i32_0 = arith.constant 0 : i32
    %c0_i32_1 = arith.constant 0 : i32
    return %c0_i32, %c0_i32_0 : i32, i32
  }
  func.func @transform_4(%arg0: i32) -> (i32, i32) {
    %c0_i32 = arith.constant 0 : i32
    %c0_i32_0 = arith.constant 0 : i32
    %c0_i32_1 = arith.constant 0 : i32
    return %c0_i32, %c0_i32_0 : i32, i32
  }
  func.func @transform_5(%arg0: i32) -> (i32, i32) {
    %c0_i32 = arith.constant 0 : i32
    %c0_i32_0 = arith.constant 0 : i32
    return %arg0, %c0_i32 : i32, i32
  }
}

</mosaic_0001>

<bundles_post_ra>
// kernel: tpu_custom_call.1
= control target key start
LH: loop header
LB: loop body
LE: loop exit
PB: predicated region body
PF: predicated region fallthrough
CT: control target
= control target key end

     0   :  { %vm37_vm0 = vcmask 261120   ;;  %s510_s0 = inlined_call_operand.vmem [shape: f32[64,32], index: 0, kind: input, shape index: {}]   ;;  %s511_s1 = inlined_call_operand.vmem [shape: f32[32,32], index: 1, kind: input, shape index: {}]   ;;  %s512_s2 = inlined_call_operand.vmem [shape: f32[1,32], index: 2, kind: input, shape index: {}]   ;;  %s513_s3 = inlined_call_operand.vmem [shape: f32[32,128], index: 3, kind: input, shape index: {}]   ;;  %s514_s4 = inlined_call_operand.vmem [shape: f32[1,128], index: 4, kind: input, shape index: {}]   ;;  %s515_s5 = inlined_call_operand.hbm [shape: f32[64,128], index: 5, kind: output, shape index: {}]  }
   0x1   :  { %v32_v0 = vld [vmem:[%s511_s1 + $0x18] sm:$0xff]  ;;  %v31_v1 = vld [vmem:[%s511_s1 + $0x10] sm:$0xff]  ;;  %v30_v2 = vld [vmem:[%s511_s1 + $0x8] sm:$0xff] }
   0x2   :  { %74 = vmatpush.msra.mxu0 %v32_v0  ;;  %317 = vmatpush.msra.mxu2 %v32_v0  ;;  %v29_v3 = vld [vmem:[%s511_s1] sm:$0xff]  ;;  %v114_v5 = vld [vmem:[%s513_s3 + $0x18] sm:$0xff] }
   0x3   :  { %v21_v4 = vld [vmem:[%s510_s0] sm:$0xff] }
   0x4   :  { %75 = vmatpush.msra.mxu0 %v31_v1  ;;  %318 = vmatpush.msra.mxu2 %v31_v1  ;;  %v25_v6 = vld [vmem:[%s510_s0 + $0x20] sm:$0xff] }
   0x6   :  { %76 = vmatpush.msra.mxu0 %v30_v2  ;;  %319 = vmatpush.msra.mxu2 %v30_v2 }
   0x7   :  { %10 = vsyncpa [#allocation3], 0  ;;  %155 = vmatpush.msra.mxu1 %v114_v5  ;;  %321 = vmatpush.msra.mxu3 %v114_v5  ;;  %v22_v7 = vld [vmem:[%s510_s0 + $0x8] sm:$0xff]  ;;  %v23_v9 = vld [vmem:[%s510_s0 + $0x10] sm:$0xff]  ;;  %v184_v41 = vlaneseq  ;;  %s289_s28 = sshll.u32 %s515_s5, 4  ;;  %s389_s29 = smov 128   ;;  %s290_s28 = int_to_ptr.hbm [resolvable:$true] %s289_s28 }
   0x8   :  { %77 = vmatpush.msra.mxu0 %v29_v3  ;;  %320 = vmatpush.msra.mxu2 %v29_v3  ;;  %v26_v8 = vld [vmem:[%s510_s0 + $0x28] sm:$0xff]  ;;  %v27_v10 = vld [vmem:[%s510_s0 + $0x30] sm:$0xff]  ;;  %v24_v11 = vld [vmem:[%s510_s0 + $0x18] sm:$0xff]  ;;  %s390_s30 = smov 8  }
   0x9   :  { %301 = vmatmul.msk.f32.vlgmr.msra.gmra.mxu0 %vm37_vm0, %v21_v4  ;;  %305 = vmatmul.msk.f32.vlgmr.msra.gmra.mxu2 %vm37_vm0, %v25_v6  ;;  %v28_v12 = vld [vmem:[%s510_s0 + $0x38] sm:$0xff]  ;;  %v113_v13 = vld [vmem:[%s513_s3 + $0x10] sm:$0xff]  ;;  %v112_v14 = vld [vmem:[%s513_s3 + $0x8] sm:$0xff]  ;;  %v185_v42 = vand.u32 127, %v184_v41 }
   0xa   :  { %156 = vmatpush.msra.mxu1 %v113_v13  ;;  %322 = vmatpush.msra.mxu3 %v113_v13  ;;  %v111_v15 = vld [vmem:[%s513_s3] sm:$0xff] }
   0xb   :  { %v328_v16 = vld [vmem:[%s512_s2] ss:$0 sm:$0xff]  ;;  %vm186_vm1 = vcmp.lt.s32.totalorder %v185_v42, 8 }
   0xc   :  { %157 = vmatpush.msra.mxu1 %v112_v14  ;;  %323 = vmatpush.msra.mxu3 %v112_v14  ;;  %v329_v43 = vld [vmem:[%s514_s4] ss:$0 sm:$0xff]  ;;  %s388_s4 = smov [#allocation2]  }
   0xd   :  { %s287_s25 = sshll.u32 %s388_s4, 4  ;;  %s288_s25 = int_to_ptr.vmem [resolvable:$true] %s287_s25 }
   0xe   :  { %158 = vmatpush.msra.mxu1 %v111_v15  ;;  %324 = vmatpush.msra.mxu3 %v111_v15 }
  0x11   :  { %302 = vmatmul.msk.f32.gmra.mxu0 %vm37_vm0, %v22_v7  ;;  %306 = vmatmul.msk.f32.gmra.mxu2 %vm37_vm0, %v26_v8 }
  0x19   :  { %303 = vmatmul.msk.f32.gmra.mxu0 %vm37_vm0, %v23_v9  ;;  %307 = vmatmul.msk.f32.gmra.mxu2 %vm37_vm0, %v27_v10 }
  0x21   :  { %304 = vmatmul.msk.f32.gmra.mxu0 %vm37_vm0, %v24_v11  ;;  %308 = vmatmul.msk.f32.gmra.mxu2 %vm37_vm0, %v28_v12 }
  0x86   :  { %v79_v17 = vpop.f32.mrf.mxu0 }
  0x87   :  { %v80_v18 = vadd.f32 %v328_v16, %v79_v17 }
  0x89   :  { %v103_v19 = vmax.f32 %v80_v18, 0.0 }
  0x8b   :  { %309 = vmatmul.msk.f32.vlgmr.msra.gmra.mxu1 %vm37_vm0, %v103_v19 }
  0x8c   :  { %v91_v20 = vpop.f32.mrf.mxu2 }
  0x8d   :  { %v92_v21 = vadd.f32 %v328_v16, %v91_v20 }
  0x8e   :  { %v82_v22 = vpop.f32.mrf.mxu0 }
  0x8f   :  { %v107_v23 = vmax.f32 %v92_v21, 0.0  ;;  %v83_v24 = vadd.f32 %v328_v16, %v82_v22 }
  0x91   :  { %v104_v25 = vmax.f32 %v83_v24, 0.0  ;;  %313 = vmatmul.msk.f32.vlgmr.msra.gmra.mxu3 %vm37_vm0, %v107_v23 }
  0x93   :  { %310 = vmatmul.msk.f32.gmra.mxu1 %vm37_vm0, %v104_v25 }
  0x94   :  { %v94_v26 = vpop.f32.mrf.mxu2 }
  0x95   :  { %v95_v27 = vadd.f32 %v328_v16, %v94_v26 }
  0x96   :  { %v85_v28 = vpop.f32.mrf.mxu0 }
  0x97   :  { %v108_v29 = vmax.f32 %v95_v27, 0.0  ;;  %v86_v30 = vadd.f32 %v328_v16, %v85_v28 }
  0x99   :  { %v105_v31 = vmax.f32 %v86_v30, 0.0  ;;  %314 = vmatmul.msk.f32.gmra.mxu3 %vm37_vm0, %v108_v29 }
  0x9b   :  { %311 = vmatmul.msk.f32.gmra.mxu1 %vm37_vm0, %v105_v31 }
  0x9c   :  { %v97_v32 = vpop.f32.mrf.mxu2 }
  0x9d   :  { %v98_v33 = vadd.f32 %v328_v16, %v97_v32 }
  0x9e   :  { %v88_v34 = vpop.f32.mrf.mxu0 }
  0x9f   :  { %v109_v35 = vmax.f32 %v98_v33, 0.0  ;;  %v89_v36 = vadd.f32 %v328_v16, %v88_v34 }
  0xa1   :  { %v106_v37 = vmax.f32 %v89_v36, 0.0  ;;  %315 = vmatmul.msk.f32.gmra.mxu3 %vm37_vm0, %v109_v35 }
  0xa3   :  { %312 = vmatmul.msk.f32.gmra.mxu1 %vm37_vm0, %v106_v37 }
  0xa4   :  { %v100_v38 = vpop.f32.mrf.mxu2 }
  0xa5   :  { %v101_v39 = vadd.f32 %v328_v16, %v100_v38 }
  0xa7   :  { %v110_v40 = vmax.f32 %v101_v39, 0.0 }
  0xa9   :  { %316 = vmatmul.msk.f32.gmra.mxu3 %vm37_vm0, %v110_v40 }
 0x108   :  { %v160_v44 = vpop.f32.mrf.mxu1 }
 0x109   :  { %v161_v45 = vadd.f32 %v329_v43, %v160_v44 }
 0x10b   :  { %v187_v46 = vsel %vm186_vm1, %v161_v45, -1e+30 }
 0x10c   :  { %195 = vmax.xlane.f32.xlu0 %v187_v46 }
 0x110   :  { %v163_v47 = vpop.f32.mrf.mxu1 }
 0x111   :  { %v164_v48 = vadd.f32 %v329_v43, %v163_v47 }
 0x113   :  { %v188_v49 = vsel %vm186_vm1, %v164_v48, -1e+30 }
 0x114   :  { %v172_v50 = vpop.f32.mrf.mxu3  ;;  %197 = vmax.xlane.f32.xlu0 %v188_v49 }
 0x115   :  { %v173_v51 = vadd.f32 %v329_v43, %v172_v50 }
 0x117   :  { %v191_v52 = vsel %vm186_vm1, %v173_v51, -1e+30 }
 0x118   :  { %203 = vmax.xlane.f32.xlu2 %v191_v52  ;;  %v166_v53 = vpop.f32.mrf.mxu1 }
 0x119   :  { %v167_v54 = vadd.f32 %v329_v43, %v166_v53 }
 0x11b   :  { %v189_v55 = vsel %vm186_vm1, %v167_v54, -1e+30 }
 0x11c   :  { %v175_v56 = vpop.f32.mrf.mxu3  ;;  %199 = vmax.xlane.f32.xlu1 %v189_v55 }
 0x11d   :  { %v176_v57 = vadd.f32 %v329_v43, %v175_v56 }
 0x11f   :  { %v192_v58 = vsel %vm186_vm1, %v176_v57, -1e+30 }
 0x120   :  { %205 = vmax.xlane.f32.xlu2 %v192_v58  ;;  %v169_v59 = vpop.f32.mrf.mxu1 }
 0x121   :  { %v170_v60 = vadd.f32 %v329_v43, %v169_v59 }
 0x123   :  { %v190_v61 = vsel %vm186_vm1, %v170_v60, -1e+30 }
 0x124   :  { %v178_v62 = vpop.f32.mrf.mxu3  ;;  %201 = vmax.xlane.f32.xlu1 %v190_v61 }
 0x125   :  { %v179_v63 = vadd.f32 %v329_v43, %v178_v62 }
 0x127   :  { %v193_v0 = vsel %vm186_vm1, %v179_v63, -1e+30 }
 0x128   :  { %207 = vmax.xlane.f32.xlu0 %v193_v0 }
 0x12c   :  { %v181_v1 = vpop.f32.mrf.mxu3 }
 0x12d   :  { %v182_v2 = vadd.f32 %v329_v43, %v181_v1 }
 0x12f   :  { %v194_v3 = vsel %vm186_vm1, %v182_v2, -1e+30 }
 0x130   :  { %209 = vmax.xlane.f32.xlu1 %v194_v3 }
 0x17f   :  { %v196_v4 = vpop.xlane.xlu0 %195 }
 0x180   :  { %v211_v5 = vsub.f32 %v187_v46, %v196_v4 }
 0x182   :  { %v219_v6 = vmul.f32 1.442695, %v211_v5 }
 0x184   :  { %330 = vpow2.f32 %v219_v6 }
 0x187   :  { %v198_v7 = vpop.xlane.xlu0 %197 }
 0x188   :  { %v212_v8 = vsub.f32 %v188_v49, %v198_v7 }
 0x18a   :  { %v331_v9 = vpop.eup %330  ;;  %v221_v10 = vmul.f32 1.442695, %v212_v8 }
 0x18b   :  { %v204_v11 = vpop.xlane.xlu2 %203  ;;  %235 = vadd.xlane.f32.xlu2 %v331_v9 }
 0x18c   :  { %332 = vpow2.f32 %v221_v10  ;;  %v499_v12 = vsub.f32 %v191_v52, %v204_v11 }
 0x18e   :  { %v227_v13 = vmul.f32 1.442695, %v499_v12 }
 0x18f   :  { %v200_v14 = vpop.xlane.xlu1 %199 }
 0x190   :  { %v213_v15 = vsub.f32 %v189_v55, %v200_v14  ;;  %334 = vpow2.f32 %v227_v13 }
 0x192   :  { %v333_v16 = vpop.eup %332  ;;  %v223_v17 = vmul.f32 1.442695, %v213_v15 }
 0x193   :  { %v206_v18 = vpop.xlane.xlu2 %205  ;;  %237 = vadd.xlane.f32.xlu0 %v333_v16 }
 0x194   :  { %336 = vpow2.f32 %v223_v17  ;;  %v502_v19 = vsub.f32 %v192_v58, %v206_v18 }
 0x196   :  { %v229_v20 = vmul.f32 1.442695, %v502_v19  ;;  %v335_v23 = vpop.eup %334 }
 0x197   :  { %v202_v21 = vpop.xlane.xlu1 %201 }
 0x198   :  { %v214_v22 = vsub.f32 %v190_v61, %v202_v21  ;;  %338 = vpow2.f32 %v229_v20 }
 0x19a   :  { %v337_v24 = vpop.eup %336  ;;  %v225_v25 = vmul.f32 1.442695, %v214_v22 }
 0x19b   :  { %239 = vadd.xlane.f32.xlu1 %v337_v24  ;;  %243 = vadd.xlane.f32.xlu0 %v335_v23  ;;  %v208_v26 = vpop.xlane.xlu0 %207 }
 0x19c   :  { %340 = vpow2.f32 %v225_v25  ;;  %v217_v27 = vsub.f32 %v193_v0, %v208_v26 }
 0x19e   :  { %v231_v28 = vmul.f32 1.442695, %v217_v27  ;;  %v339_v29 = vpop.eup %338 }
 0x1a0   :  { %342 = vpow2.f32 %v231_v28 }
 0x1a2   :  { %v341_v30 = vpop.eup %340 }
 0x1a3   :  { %245 = vadd.xlane.f32.xlu1 %v339_v29  ;;  %v210_v31 = vpop.xlane.xlu1 %209  ;;  %241 = vadd.xlane.f32.xlu2 %v341_v30 }
 0x1a4   :  { %v218_v32 = vsub.f32 %v194_v3, %v210_v31 }
 0x1a6   :  { %v233_v33 = vmul.f32 1.442695, %v218_v32  ;;  %v343_v34 = vpop.eup %342 }
 0x1a8   :  { %344 = vpow2.f32 %v233_v33 }
 0x1ab   :  { %247 = vadd.xlane.f32.xlu2 %v343_v34 }
 0x1ae   :  { %v345_v35 = vpop.eup %344 }
 0x1af   :  { %249 = vadd.xlane.f32.xlu0 %v345_v35 }
 0x1fe   :  { %v236_v36 = vpop.xlane.xlu2 %235 }
 0x1ff   :  { %346 = vlog2.f32 %v236_v36 }
 0x205   :  { %v347_v37 = vpop.eup %346 }
 0x206   :  { %v252_v38 = vmul.f32 0.6931472, %v347_v37  ;;  %v238_v39 = vpop.xlane.xlu0 %237 }
 0x207   :  { %348 = vlog2.f32 %v238_v39 }
 0x208   :  { %v267_v40 = vsub.f32 %v211_v5, %v252_v38 }
 0x20a   :  { %275 = vst [vmem:[#allocation2] sm:$0xff] %v267_v40 }
 0x20d   :  { %v349_v41 = vpop.eup %348 }
 0x20e   :  { %v254_v42 = vmul.f32 0.6931472, %v349_v41  ;;  %v240_v43 = vpop.xlane.xlu1 %239  ;;  %v244_v44 = vpop.xlane.xlu0 %243 }
 0x20f   :  { %350 = vlog2.f32 %v240_v43 }
 0x210   :  { %v268_v45 = vsub.f32 %v212_v8, %v254_v42  ;;  %352 = vlog2.f32 %v244_v44 }
 0x212   :  { %276 = vst [vmem:[#allocation2 + $0x8] sm:$0xff] %v268_v45 }
 0x215   :  { %v351_v46 = vpop.eup %350 }
 0x216   :  { %v353_v47 = vpop.eup %352  ;;  %v256_v48 = vmul.f32 0.6931472, %v351_v46  ;;  %v246_v49 = vpop.xlane.xlu1 %245 }
 0x217   :  { %v242_v50 = vpop.xlane.xlu2 %241  ;;  %v260_v51 = vmul.f32 0.6931472, %v353_v47  ;;  %354 = vlog2.f32 %v246_v49 }
 0x218   :  { %v269_v52 = vsub.f32 %v213_v15, %v256_v48  ;;  %356 = vlog2.f32 %v242_v50 }
 0x219   :  { %v271_v53 = vsub.f32 %v499_v12, %v260_v51 }
 0x21a   :  { %277 = vst [vmem:[#allocation2 + $0x10] sm:$0xff] %v269_v52 }
 0x21b   :  { %279 = vst [vmem:[#allocation2 + $0x20] sm:$0xff] %v271_v53 }
 0x21d   :  { %v355_v54 = vpop.eup %354 }
 0x21e   :  { %v357_v55 = vpop.eup %356  ;;  %v262_v56 = vmul.f32 0.6931472, %v355_v54 }
 0x21f   :  { %v248_v57 = vpop.xlane.xlu2 %247  ;;  %v258_v58 = vmul.f32 0.6931472, %v357_v55 }
 0x220   :  { %358 = vlog2.f32 %v248_v57  ;;  %v272_v59 = vsub.f32 %v502_v19, %v262_v56 }
 0x221   :  { %v270_v60 = vsub.f32 %v214_v22, %v258_v58 }
 0x222   :  { %280 = vst [vmem:[#allocation2 + $0x28] sm:$0xff] %v272_v59  ;;  %v250_v61 = vpop.xlane.xlu0 %249 }
 0x223   :  { %278 = vst [vmem:[#allocation2 + $0x18] sm:$0xff] %v270_v60  ;;  %360 = vlog2.f32 %v250_v61 }
 0x226   :  { %v359_v62 = vpop.eup %358 }
 0x227   :  { %v264_v63 = vmul.f32 0.6931472, %v359_v62 }
 0x229   :  { %v273_v0 = vsub.f32 %v217_v27, %v264_v63  ;;  %v361_v1 = vpop.eup %360 }
 0x22a   :  { %v266_v2 = vmul.f32 0.6931472, %v361_v1 }
 0x22b   :  { %281 = vst [vmem:[#allocation2 + $0x30] sm:$0xff] %v273_v0 }
 0x22c   :  { %v274_v3 = vsub.f32 %v218_v32, %v266_v2 }
 0x22e   :  { %282 = vst [vmem:[#allocation2 + $0x38] sm:$0xff] %v274_v3 }
 0x22f   :  { %295 = dma.vmem_to_hbm [thread:$0]  %s288_s25, 1024, %s290_s28, [#allocation3], %s389_s29, %s389_s29, %s390_s30  }
 0x230   :  { %386 = dma.done.wait [#allocation3], 1024  }
 0x231   :  { %387 = vsyncadd [#allocation3], 4294966272 }
 0x232   :  { %300 = vsyncpa [#allocation3], 1 }

</bundles_post_ra>
